<compile_context>
chip_gen: v6e
topology: v6e:2x2x1
jax: 0.10.0
libtpu: 0.0.40
codegen_flags: <defaults>
</compile_context>

<pallas_src>
import jax
import jax.numpy as jnp
from jax.experimental import pallas as pl
from jax.experimental.pallas import tpu as pltpu  # noqa: F401  (TPU backend)


# ------------------------------ fused kernel ------------------------------
def classica_minil_kernel(x_ref, w1_ref, b1_ref, wblk_ref, bblk_ref,
                          w4_ref, b4_ref, o_ref):
    # x_ref:   (N, 64)      flattened input
    # w1_ref:  (64, 2H)     clayer_1 weight,  b1_ref: (1, 2H)
    # wblk_ref:(2H, 2H)     block-diag(clayer_2, clayer_3), bblk_ref: (1, 2H)
    # w4_ref:  (2H, 10)     clayer_4 weight,  b4_ref: (1, 10)
    # o_ref:   (N, 10)      softmax output
    x = x_ref[...]

    # clayer_1
    h = jnp.dot(x, w1_ref[...], preferred_element_type=jnp.float32) + b1_ref[...]

    # split -> clayer_2 / clayer_3 -> cat, fused as one block-diagonal matmul
    h = jnp.dot(h, wblk_ref[...], preferred_element_type=jnp.float32) + bblk_ref[...]

    # clayer_4
    logits = (jnp.dot(h, w4_ref[...], preferred_element_type=jnp.float32)
              + b4_ref[...])

    # softmax(dim=1), numerically stabilized
    m = jnp.max(logits, axis=-1, keepdims=True)
    e = jnp.exp(logits - m)
    o_ref[...] = e / jnp.sum(e, axis=-1, keepdims=True)


def classica_minil_forward(x_flat, w1, b1, wblk, bblk, w4, b4):
    N = x_flat.shape[0]
    C = w4.shape[-1]

    def full(shape):
        return pl.BlockSpec(shape, lambda s=len(shape): (0,) * s)

    return pl.pallas_call(
        classica_minil_kernel,
        out_shape=jax.ShapeDtypeStruct((N, C), jnp.float32),
        in_specs=[full(x_flat.shape), full(w1.shape), full(b1.shape),
                  full(wblk.shape), full(bblk.shape),
                  full(w4.shape), full(b4.shape)],
        out_specs=full((N, C)),
    )(x_flat, w1, b1, wblk, bblk, w4, b4)


# ---------------------------- model container -----------------------------
class ClassicaMinilModelPallas:
    """Pallas port of ClassicaMinilModel (forward pass only)."""

    def __init__(self, key, nb_hidden_neurons=2, num_classes=10, in_features=8 * 8):
        H = nb_hidden_neurons
        ks = jax.random.split(key, 8)
        s = 0.1
        self.w1 = s * jax.random.normal(ks[0], (in_features, 2 * H), jnp.float32)
        self.b1 = s * jax.random.normal(ks[1], (1, 2 * H), jnp.float32)
        w2 = s * jax.random.normal(ks[2], (H, H), jnp.float32)
        b2 = s * jax.random.normal(ks[3], (1, H), jnp.float32)
        w3 = s * jax.random.normal(ks[4], (H, H), jnp.float32)
        b3 = s * jax.random.normal(ks[5], (1, H), jnp.float32)
        self.w4 = s * jax.random.normal(ks[6], (2 * H, num_classes), jnp.float32)
        self.b4 = s * jax.random.normal(ks[7], (1, num_classes), jnp.float32)

        # Fold split -> (clayer_2, clayer_3) -> cat into one block-diagonal
        # matmul done once at init (numerically identical to split/cat).
        wblk = jnp.zeros((2 * H, 2 * H), jnp.float32)
        wblk = wblk.at[:H, :H].set(w2)
        wblk = wblk.at[H:, H:].set(w3)
        self.wblk = wblk
        self.bblk = jnp.concatenate([b2, b3], axis=-1)   # (1, 2H)

    def __call__(self, x):
        N = x.shape[0]
        # torch.reshape(x, (N, -1)); row-major flatten is layout-metadata only.
        x_flat = jnp.reshape(x, (N, -1)).astype(jnp.float32)
        return classica_minil_forward(x_flat, self.w1, self.b1,
                                      self.wblk, self.bblk,
                                      self.w4, self.b4)


if __name__ == "__main__":
    key = jax.random.PRNGKey(0)
    kx, kp = jax.random.split(key)

    N = 2
    x = jax.random.normal(kx, (N, 8, 8), jnp.float32)   # flattens to (N, 64)

    model = ClassicaMinilModelPallas(key=kp, nb_hidden_neurons=2, num_classes=10)
    y = model(x)
    jax.block_until_ready(y)

    assert y.shape == (N, 10)
    # softmax rows must sum to ~1
    assert bool(jnp.all(jnp.abs(jnp.sum(y, axis=1) - 1.0) < 1e-5))
    print("KERNEL_OK")
</pallas_src>

<mosaic_0001>
module attributes {stable_mosaic.version = 11 : i64} {
  func.func @classica_minil_kernel(%arg0: memref<2x64xf32, #tpu.memory_space<vmem>>, %arg1: memref<64x4xf32, #tpu.memory_space<vmem>>, %arg2: memref<1x4xf32, #tpu.memory_space<vmem>>, %arg3: memref<4x4xf32, #tpu.memory_space<vmem>>, %arg4: memref<1x4xf32, #tpu.memory_space<vmem>>, %arg5: memref<4x10xf32, #tpu.memory_space<vmem>>, %arg6: memref<1x10xf32, #tpu.memory_space<vmem>>, %arg7: memref<2x10xf32, #tpu.memory_space<vmem>>) attributes {dimension_semantics = [], scalar_prefetch = 0 : i64, scratch_operands = 0 : i64, tpu.core_type = #tpu.core_type<tc>} {
    %c0 = arith.constant 0 : index
    %c0_0 = arith.constant 0 : index
    %0 = vector.load %arg0[%c0, %c0_0] : memref<2x64xf32, #tpu.memory_space<vmem>>, vector<2x64xf32>
    %c0_1 = arith.constant 0 : index
    %c0_2 = arith.constant 0 : index
    %1 = vector.load %arg1[%c0_1, %c0_2] : memref<64x4xf32, #tpu.memory_space<vmem>>, vector<64x4xf32>
    %cst = arith.constant dense<0.000000e+00> : vector<2x4xf32>
    %2 = tpu.matmul %0, %1, %cst {dimension_numbers = #tpu.dot_dimension_numbers<[1], [0], [0], [1], [0, 0, 1, 1], [], []>} : vector<2x64xf32>, vector<64x4xf32>, vector<2x4xf32> -> vector<2x4xf32>
    %c0_3 = arith.constant 0 : index
    %c0_4 = arith.constant 0 : index
    %3 = vector.load %arg2[%c0_3, %c0_4] : memref<1x4xf32, #tpu.memory_space<vmem>>, vector<1x4xf32>
    %4 = vector.broadcast %3 : vector<1x4xf32> to vector<2x4xf32>
    %5 = arith.addf %2, %4 : vector<2x4xf32>
    %c0_5 = arith.constant 0 : index
    %c0_6 = arith.constant 0 : index
    %6 = vector.load %arg3[%c0_5, %c0_6] : memref<4x4xf32, #tpu.memory_space<vmem>>, vector<4x4xf32>
    %cst_7 = arith.constant dense<0.000000e+00> : vector<2x4xf32>
    %7 = tpu.matmul %5, %6, %cst_7 {dimension_numbers = #tpu.dot_dimension_numbers<[1], [0], [0], [1], [0, 0, 1, 1], [], []>} : vector<2x4xf32>, vector<4x4xf32>, vector<2x4xf32> -> vector<2x4xf32>
    %c0_8 = arith.constant 0 : index
    %c0_9 = arith.constant 0 : index
    %8 = vector.load %arg4[%c0_8, %c0_9] : memref<1x4xf32, #tpu.memory_space<vmem>>, vector<1x4xf32>
    %9 = vector.broadcast %8 : vector<1x4xf32> to vector<2x4xf32>
    %10 = arith.addf %7, %9 : vector<2x4xf32>
    %c0_10 = arith.constant 0 : index
    %c0_11 = arith.constant 0 : index
    %11 = vector.load %arg5[%c0_10, %c0_11] : memref<4x10xf32, #tpu.memory_space<vmem>>, vector<4x10xf32>
    %cst_12 = arith.constant dense<0.000000e+00> : vector<2x10xf32>
    %12 = tpu.matmul %10, %11, %cst_12 {dimension_numbers = #tpu.dot_dimension_numbers<[1], [0], [0], [1], [0, 0, 1, 1], [], []>} : vector<2x4xf32>, vector<4x10xf32>, vector<2x10xf32> -> vector<2x10xf32>
    %c0_13 = arith.constant 0 : index
    %c0_14 = arith.constant 0 : index
    %13 = vector.load %arg6[%c0_13, %c0_14] : memref<1x10xf32, #tpu.memory_space<vmem>>, vector<1x10xf32>
    %14 = vector.broadcast %13 : vector<1x10xf32> to vector<2x10xf32>
    %15 = arith.addf %12, %14 : vector<2x10xf32>
    %cst_15 = arith.constant dense<0xFF800000> : vector<2xf32>
    %16 = vector.multi_reduction <maximumf>, %15, %cst_15 [1] : vector<2x10xf32> to vector<2xf32>
    %17 = vector.shape_cast %16 : vector<2xf32> to vector<2x1xf32>
    %18 = vector.broadcast %17 : vector<2x1xf32> to vector<2x10xf32>
    %19 = arith.subf %15, %18 : vector<2x10xf32>
    %20 = math.exp %19 : vector<2x10xf32>
    %cst_16 = arith.constant dense<0.000000e+00> : vector<2xf32>
    %21 = vector.multi_reduction <add>, %20, %cst_16 [1] : vector<2x10xf32> to vector<2xf32>
    %22 = vector.shape_cast %21 : vector<2xf32> to vector<2x1xf32>
    %23 = vector.broadcast %22 : vector<2x1xf32> to vector<2x10xf32>
    %24 = arith.divf %20, %23 : vector<2x10xf32>
    %c0_17 = arith.constant 0 : index
    %c0_18 = arith.constant 0 : index
    %25 = vector.load %arg7[%c0_17, %c0_18] : memref<2x10xf32, #tpu.memory_space<vmem>>, vector<2x10xf32>
    tpu.vector_store %arg7[%c0_17, %c0_18], %24 {strides = array<i32>} : memref<2x10xf32, #tpu.memory_space<vmem>>, vector<2x10xf32>,
    return
  }
}

</mosaic_0001>

<bundles_post_ra>
// kernel: tpu_custom_call.1
= control target key start
LH: loop header
LB: loop body
LE: loop exit
PB: predicated region body
PF: predicated region fallthrough
CT: control target
= control target key end

     0   :  { %v393_v1 = vmov 0.0   ;;  %vm394_vm0 = vmmov 0   ;;  %s487_s0 = inlined_call_operand.vmem [shape: f32[2,64], index: 0, kind: input, shape index: {}]   ;;  %s488_s1 = inlined_call_operand.vmem [shape: f32[64,4], index: 1, kind: input, shape index: {}]   ;;  %s489_s2 = inlined_call_operand.vmem [shape: f32[1,4], index: 2, kind: input, shape index: {}]   ;;  %s490_s3 = inlined_call_operand.vmem [shape: f32[4,4], index: 3, kind: input, shape index: {}]   ;;  %s491_s4 = inlined_call_operand.vmem [shape: f32[1,4], index: 4, kind: input, shape index: {}]   ;;  %s492_s5 = inlined_call_operand.vmem [shape: f32[4,10], index: 5, kind: input, shape index: {}]   ;;  %s493_s6 = inlined_call_operand.vmem [shape: f32[1,10], index: 6, kind: input, shape index: {}]   ;;  %s494_s7 = inlined_call_operand.hbm [shape: f32[2,10], index: 7, kind: output, shape index: {}]  }
   0x1   :  { %v35_v0 = vld [vmem:[%s488_s1 + $0x38] sm:$0xff]  ;;  %335 = vmatprep.subr.mxu0 %v393_v1  ;;  %v34_v2 = vld [vmem:[%s488_s1 + $0x30] sm:$0xff]  ;;  %351 = vmatprep.mubr.msk.f32.mxu0 %vm394_vm0, %v393_v1  ;;  %v33_v3 = vld [vmem:[%s488_s1 + $0x28] sm:$0xff] }
   0x2   :  { %336 = vmatpush3.msra.mxu0 %v35_v0  ;;  %354 = vmatprep.subr.mxu1 %v393_v1 }
   0x3   :  { %337 = vmatprep.subr.mxu0 %v393_v1  ;;  %356 = vmatprep.mubr.msk.f32.mxu1 %vm394_vm0, %v393_v1 }
   0x4   :  { %12 = vsyncpa [#allocation3], 0  ;;  %338 = vmatpush3.msra.mxu0 %v34_v2  ;;  %v32_v4 = vld [vmem:[%s488_s1 + $0x20] sm:$0xff]  ;;  %v31_v5 = vld [vmem:[%s488_s1 + $0x18] sm:$0xff]  ;;  %vm43_vm1 = vcmask 523264   ;;  %vm129_vm2 = vcmask 1043456  }
   0x5   :  { %339 = vmatprep.subr.mxu0 %v393_v1  ;;  %v30_v6 = vld [vmem:[%s488_s1 + $0x10] sm:$0xff]  ;;  %v29_v7 = vld [vmem:[%s488_s1 + $0x8] sm:$0xff]  ;;  %v28_v8 = vld [vmem:[%s488_s1] sm:$0xff]  ;;  %vm125_vm3 = vcmask 31744   ;;  %vm287_vm4 = vcmask 74752  }
   0x6   :  { %340 = vmatpush3.msra.mxu0 %v33_v3  ;;  %v27_v9 = vld [vmem:[%s487_s0] sm:$0x3] }
   0x7   :  { %341 = vmatprep.subr.mxu0 %v393_v1  ;;  %v117_v10 = vld [vmem:[%s490_s3] sm:$0xf] }
   0x8   :  { %342 = vmatpush3.msra.mxu0 %v32_v4  ;;  %355 = vmatpush3.msk.msra.mxu1 %vm129_vm2, %v117_v10  ;;  %v314_v11 = vld [vmem:[%s489_s2] ss:$0 sm:$0xff] }
   0x9   :  { %343 = vmatprep.subr.mxu0 %v393_v1  ;;  %359 = vmatprep.subr.mxu1 %v393_v1  ;;  %v203_v14 = vld [vmem:[%s492_s5] sm:$0xf] }
   0xa   :  { %344 = vmatpush3.msra.mxu0 %v31_v5  ;;  %v316_v16 = vld [vmem:[%s491_s4] ss:$0 sm:$0xff]  ;;  %s395_s4 = smov [#allocation2]  }
   0xb   :  { %345 = vmatprep.subr.mxu0 %v393_v1  ;;  %v319_v20 = vld [vmem:[%s493_s6] ss:$0 sm:$0xff]  ;;  %s306_s5 = sshll.u32 %s395_s4, 4  ;;  %s307_s5 = int_to_ptr.vmem [resolvable:$true] %s306_s5 }
   0xc   :  { %346 = vmatpush3.msra.mxu0 %v30_v6  ;;  %s371_s6 = scalar_lea.vmem %s307_s5, 32  ;;  %p376_p1 = scmp.lt.s32.totalorder %s307_s5, %s307_s5 }
   0xd   :  { %347 = vmatprep.subr.mxu0 %v393_v1  ;;  %p372_p0 = scmp.ne.s32.totalorder %s307_s5, %s371_s6  ;;  %p377_p2 = scmp.lt.s32.totalorder %s371_s6, %s371_s6 }
   0xe   :  { %348 = vmatpush3.msra.mxu0 %v29_v7 }
   0xf   :  { %349 = vmatprep.subr.mxu0 %v393_v1  ;;  %p378_p3 = por %p377_p2, %p376_p1 }
  0x10   :  { %350 = vmatpush3.msra.mxu0 %v28_v8 }
  0x11   :  { %352 = vmatmul.mubr.msk.f32.vlgmr.msra.gmra.mxu0 %vm43_vm1, %v27_v9  ;;  %p379_p4 = pnand %p378_p3, %p372_p0 }
  0xd1   :  { %v113_v12 = vpop.f32.mrf.mxu0 }
  0xd2   :  { %v114_v13 = vadd.f32 %v314_v11, %v113_v12 }
  0xd3   :  { %v353_v15 = vpop.f32.mrf.mxu0 }
  0xd4   :  { %357 = vmatmul.mubr.msk.f32.vlgmr.msra.gmra.mxu1 %vm125_vm3, %v114_v13 }
  0xd5   :  { %360 = vmatpush3.msk.msra.mxu1 %vm129_vm2, %v203_v14  ;;  %361 = vmatprep.mubr.msk.f32.mxu1 %vm394_vm0, %v393_v1 }
 0x194   :  { %v199_v17 = vpop.f32.mrf.mxu1 }
 0x195   :  { %v200_v18 = vadd.f32 %v316_v16, %v199_v17 }
 0x196   :  { %v358_v19 = vpop.f32.mrf.mxu1 }
 0x197   :  { %362 = vmatmul.mubr.msk.f32.vlgmr.msra.gmra.mxu1 %vm125_vm3, %v200_v18 }
 0x257   :  { %v283_v21 = vpop.f32.mrf.mxu1 }
 0x258   :  { %v284_v22 = vadd.f32 %v319_v20, %v283_v21 }
 0x259   :  { %v363_v23 = vpop.f32.mrf.mxu1 }
 0x25a   :  { %v288_v24 = vsel %vm287_vm4, %v284_v22, -inf }
 0x25b   :  { %289 = vmax.xlane.f32.xlu0 %v288_v24 }
 0x2e4   :  { %v290_v25 = vpop.xlane.xlu0 %289 }
 0x2e5   :  { %v291_v26 = vsub.f32 %v284_v22, %v290_v25 }
 0x2e7   :  { %v292_v27 = vmul.f32 1.442695, %v291_v26 }
 0x2e9   :  { %367 = vpow2.f32 %v292_v27 }
 0x2f6   :  { %v368_v28 = vpop.eup %367 }
 0x2f7   :  { %v294_v29 = vsel %vm287_vm4, %v368_v28, 0.0 }
 0x2f8   :  { %295 = vadd.xlane.f32.xlu0 %v294_v29 }
 0x381   :  { %v296_v30 = vpop.xlane.xlu0 %295 }
 0x382   :  { %369 = vrcp.f32 %v296_v30 }
 0x38f   :  { %v370_v31 = vpop.eup %369 }
 0x390   :  { %v298_v32 = vmul.f32 %v370_v31, %v368_v28 }
 0x392   :  { %299 = vst.msk [vmem:[#allocation2] sm:$0x3] %vm287_vm4, %v298_v32 }
 0x393   :  { %382 = shalt.err (!%p379_p4)
}
 0x394   :  { %309 = dma.vmem_to_hbm [thread:$0]  %s307_s5, 32, %s494_s7, [#allocation3]  }
 0x395   :  { %391 = dma.done.wait [#allocation3], 32  }
 0x396   :  { %392 = vsyncadd [#allocation3], 4294967264 }
 0x397   :  { %313 = vsyncpa [#allocation3], 1 }

</bundles_post_ra>
